<compile_context>
chip_gen: v7x
topology: tpu7x:2x2x1
jax: 0.10.0
libtpu: 0.0.40
codegen_flags: <defaults>
</compile_context>

<pallas_src>
import jax
import jax.numpy as jnp
from jax.experimental import pallas as pl
from jax.experimental.pallas import tpu as pltpu


def _set_embedding_kernel(cols_ref, y_ref, wb_ref, out_ref):
    """One row-block: emb = onehot(cols) @ wb (MXU), then write [emb | y]."""
    bn = cols_ref.shape[0]
    s, h = wb_ref.shape
    cols = cols_ref[...]                                            # (BN, 1) int32
    iota = jax.lax.broadcasted_iota(jnp.int32, (bn, s), 1)          # (BN, S)
    onehot = (iota == cols).astype(jnp.float32)                     # VPU compare
    emb = jnp.dot(onehot, wb_ref[...],
                  preferred_element_type=jnp.float32)               # (BN, H) MXU
    out_ref[:, :h] = emb
    out_ref[:, h:] = y_ref[...]                                     # fused hstack


def _round_up(a, b):
    return (a + b - 1) // b * b


def set_embedding_forward(x, mask, wb, K, block_rows=256):
    """Reproduces Set_Embedding.forward(x, mask).

    x, mask : (B, S)
    wb      : (S, H) float32 -- precomputed weight.T + bias (bias folded once)
    K       : static Python int, number of set bits per mask row (uniform)
    returns : (B, K, H + 1) float32
    """
    B, S = x.shape
    H = wb.shape[1]
    N = B * K

    # torch.nonzero(mask) ordering == row-major ascending flat index.
    flat_idx = jnp.nonzero(mask.reshape(-1) > 0, size=N)[0]
    cols = (flat_idx % S).astype(jnp.int32)                         # (N,)
    yvals = x.reshape(-1)[flat_idx].astype(jnp.float32)             # (N,)

    # Block over output rows; pad N up so every block is full (padded rows
    # gather wb[0] and are sliced off afterwards).
    BN = min(block_rows, _round_up(N, 8))
    N_pad = _round_up(N, BN)
    pad = N_pad - N
    if pad:
        cols = jnp.concatenate([cols, jnp.zeros((pad,), jnp.int32)])
        yvals = jnp.concatenate([yvals, jnp.zeros((pad,), jnp.float32)])
    cols2 = cols.reshape(N_pad, 1)
    y2 = yvals.reshape(N_pad, 1)
    wb = wb.astype(jnp.float32)

    out = pl.pallas_call(
        _set_embedding_kernel,
        out_shape=jax.ShapeDtypeStruct((N_pad, H + 1), jnp.float32),
        grid=(N_pad // BN,),
        in_specs=[
            pl.BlockSpec((BN, 1), lambda i: (i, 0)),        # cols block
            pl.BlockSpec((BN, 1), lambda i: (i, 0)),        # y block
            pl.BlockSpec((S, H), lambda i: (0, 0)),         # wb resident in VMEM
        ],
        out_specs=pl.BlockSpec((BN, H + 1), lambda i: (i, 0)),
        compiler_params=pltpu.CompilerParams(
            dimension_semantics=("parallel",)),             # split rows across TCs
    )(cols2, y2, wb)

    out = out[:N] if pad else out
    return out.reshape(B, K, H + 1)


def derive_k(mask):
    """Host-side, once, outside the hot path: K = popcount per row, validated uniform."""
    counts = jnp.sum(mask > 0, axis=1)
    K = int(counts[0])
    if not bool(jnp.all(counts == K)):
        raise ValueError("mask must set the same number of bits in every row "
                         "(required by the (B, K, H+1) reshape)")
    return K


if __name__ == "__main__":
    B, S, H = 2, 16, 32          # batch, set_size, hidden_size
    key = jax.random.PRNGKey(0)
    kx, kw, kb = jax.random.split(key, 3)

    x = jax.random.normal(kx, (B, S), dtype=jnp.float32)

    # Deterministic mask: K = 4 bits set per row (uniform per-row count, as the
    # torch reshape requires), different positions per row.
    mask = jnp.zeros((B, S), dtype=jnp.float32)
    mask = mask.at[0, jnp.array([1, 3, 5, 7])].set(1.0)
    mask = mask.at[1, jnp.array([0, 2, 8, 15])].set(1.0)

    # nn.Linear(S, H): weight (H, S), bias (H,) -- synthetic deterministic init.
    bound = 1.0 / (S ** 0.5)
    weight = jax.random.uniform(kw, (H, S), jnp.float32, -bound, bound)
    bias = jax.random.uniform(kb, (H,), jnp.float32, -bound, bound)

    # Hoisted out of the per-call path: bias-folded gather table and static K.
    wb = weight.T.astype(jnp.float32) + bias.astype(jnp.float32)[None, :]   # (S, H)
    K = derive_k(mask)

    out = set_embedding_forward(x, mask, wb, K)
    out = jax.block_until_ready(out)

    # Pure-JAX reference check (original one-hot formulation, no Pallas).
    N = B * K
    flat_idx = jnp.nonzero(mask.reshape(-1) > 0, size=N)[0]
    cols = flat_idx % S
    emb_ref = jnp.eye(S, dtype=jnp.float32)[cols] @ weight.T + bias
    y_ref = x.reshape(-1)[flat_idx].reshape(-1, 1)
    ref = jnp.hstack([emb_ref, y_ref]).reshape(B, K, H + 1).astype(jnp.float32)

    assert out.shape == (B, K, H + 1)
    assert out.dtype == jnp.float32
    assert jnp.allclose(out, ref, atol=1e-5, rtol=1e-5)
    print("KERNEL_OK")
</pallas_src>

<mosaic_0001>
module attributes {stable_mosaic.version = 11 : i64} {
  func.func @_set_embedding_kernel(%arg0: i32, %arg1: memref<8x1xi32, #tpu.memory_space<vmem>>, %arg2: memref<8x1xf32, #tpu.memory_space<vmem>>, %arg3: memref<16x32xf32, #tpu.memory_space<vmem>>, %arg4: memref<8x33xf32, #tpu.memory_space<vmem>>) attributes {dimension_semantics = [#tpu.dimension_semantics<parallel>], iteration_bounds = array<i64: 1>, scalar_prefetch = 0 : i64, scratch_operands = 0 : i64, tpu.core_type = #tpu.core_type<tc>, window_params = [{transform_indices = @transform_0, window_bounds = array<i64: 8, 1>}, {transform_indices = @transform_1, window_bounds = array<i64: 8, 1>}, {pipeline_mode = #tpu.pipeline_mode<synchronous>, transform_indices = @transform_2, window_bounds = array<i64: 16, 32>}, {transform_indices = @transform_3, window_bounds = array<i64: 8, 33>}]} {
    %c0 = arith.constant 0 : index
    %c0_0 = arith.constant 0 : index
    %0 = vector.load %arg1[%c0, %c0_0] : memref<8x1xi32, #tpu.memory_space<vmem>>, vector<8x1xi32>
    %1 = tpu.iota {dimensions = array<i32: 1>} : vector<8x16xi32>
    %2 = vector.broadcast %0 : vector<8x1xi32> to vector<8x16xi32>
    %3 = arith.cmpi eq, %1, %2 : vector<8x16xi32>
    %4 = arith.extui %3 : vector<8x16xi1> to vector<8x16xi32>
    %5 = arith.sitofp %4 : vector<8x16xi32> to vector<8x16xf32>
    %c0_1 = arith.constant 0 : index
    %c0_2 = arith.constant 0 : index
    %6 = vector.load %arg3[%c0_1, %c0_2] : memref<16x32xf32, #tpu.memory_space<vmem>>, vector<16x32xf32>
    %cst = arith.constant dense<0.000000e+00> : vector<8x32xf32>
    %7 = tpu.matmul %5, %6, %cst {dimension_numbers = #tpu.dot_dimension_numbers<[1], [0], [0], [1], [0, 0, 1, 1], [], []>} : vector<8x16xf32>, vector<16x32xf32>, vector<8x32xf32> -> vector<8x32xf32>
    %c0_3 = arith.constant 0 : index
    %c0_4 = arith.constant 0 : index
    %8 = vector.load %arg4[%c0_3, %c0_4] : memref<8x33xf32, #tpu.memory_space<vmem>>, vector<8x32xf32>
    tpu.vector_store %arg4[%c0_3, %c0_4], %7 {strides = array<i32>} : memref<8x33xf32, #tpu.memory_space<vmem>>, vector<8x32xf32>,
    %c0_5 = arith.constant 0 : index
    %c0_6 = arith.constant 0 : index
    %9 = vector.load %arg2[%c0_5, %c0_6] : memref<8x1xf32, #tpu.memory_space<vmem>>, vector<8x1xf32>
    %c0_7 = arith.constant 0 : index
    %c32 = arith.constant 32 : index
    %10 = vector.load %arg4[%c0_7, %c32] : memref<8x33xf32, #tpu.memory_space<vmem>>, vector<8x1xf32>
    tpu.vector_store %arg4[%c0_7, %c32], %9 {strides = array<i32>} : memref<8x33xf32, #tpu.memory_space<vmem>>, vector<8x1xf32>,
    return
  }
  func.func @transform_0(%arg0: i32) -> (i32, i32) {
    %c0_i32 = arith.constant 0 : i32
    %c0_i32_0 = arith.constant 0 : i32
    return %arg0, %c0_i32 : i32, i32
  }
  func.func @transform_1(%arg0: i32) -> (i32, i32) {
    %c0_i32 = arith.constant 0 : i32
    %c0_i32_0 = arith.constant 0 : i32
    return %arg0, %c0_i32 : i32, i32
  }
  func.func @transform_2(%arg0: i32) -> (i32, i32) {
    %c0_i32 = arith.constant 0 : i32
    %c0_i32_0 = arith.constant 0 : i32
    %c0_i32_1 = arith.constant 0 : i32
    return %c0_i32, %c0_i32_0 : i32, i32
  }
  func.func @transform_3(%arg0: i32) -> (i32, i32) {
    %c0_i32 = arith.constant 0 : i32
    %c0_i32_0 = arith.constant 0 : i32
    return %arg0, %c0_i32 : i32, i32
  }
}

</mosaic_0001>

<bundles_post_ra>
// kernel: tpu_custom_call.1
= control target key start
LH: loop header
LB: loop body
LE: loop exit
PB: predicated region body
PF: predicated region fallthrough
CT: control target
= control target key end

     0   :  { %v169_v3 = vmov 0   ;;  %v170_v4 = vmov 0.0|0.0   ;;  %s219_s0 = inlined_call_operand.vmem [shape: s32[8,1], index: 0, kind: input, shape index: {}]   ;;  %s220_s1 = inlined_call_operand.vmem [shape: f32[8,1], index: 1, kind: input, shape index: {}]   ;;  %s221_s2 = inlined_call_operand.vmem [shape: f32[16,32], index: 2, kind: input, shape index: {}]   ;;  %s222_s3 = inlined_call_operand.hbm [shape: f32[8,33], index: 3, kind: output, shape index: {}]  }
   0x1   :  { %v15_v0 = vld [vmem:[%s219_s0] sm:$0xff]  ;;  %v25_v2 = vld [vmem:[%s221_s2 + $0x8] sm:$0xff]  ;;  %144 = vset.pattern.permute.xlu0 %v169_v3  ;;  %135 = vmatprep.subr.bf16.mxu0 %v170_v4 }
   0x2   :  { %v24_v1 = vld [vmem:[%s221_s2] sm:$0xff] }
   0x3   :  { %v136_v5 = vpack.c.bf16 %v25_v2, %v24_v1 }
   0x4   :  { %8 = vsyncpa [#allocation3], 0  ;;  %19 = vperm.xlu0 %144, %v15_v0   ;;  %vm171_vm0 = vmmov 0   ;;  %v172_v6 = vmov 0.0   ;;  %v102_v7 = vld [vmem:[%s220_s1] sm:$0xff]  ;;  %s173_s19 = smov 32   ;;  %v16_v8 = vlaneseq }
   0x5   :  { %137 = vmatpush3.bf16.msra.mxu0 %v136_v5  ;;  %132 = vmatprep.mubr.msk.f32.mxu0 %vm171_vm0, %v172_v6  ;;  %vm26_vm1 = vcmask 130048   ;;  %s174_s2 = smov [#allocation2]   ;;  %vm100_vm3 = vcmask 261120   ;;  %vm107_vm4 = vcmask 269568  }
   0x6   :  { %v17_v9 = vand.u32 127, %v16_v8  ;;  %s115_s20 = sshll.u32 %s174_s2, 4  ;;  %s116_s20 = int_to_ptr.vmem [resolvable:$true] %s115_s20 }
   0x7   :  { %s145_s1 = scalar_lea.vmem %s116_s20, 128  ;;  %p150_p1 = scmp.lt.s32.totalorder %s116_s20, %s116_s20 }
   0x8   :  { %104 = vrot.lane.b32.xlu0 %v102_v7, %s173_s19  ;;  %p146_p0 = scmp.ne.s32.totalorder %s116_s20, %s145_s1  ;;  %p151_p2 = scmp.lt.s32.totalorder %s145_s1, %s145_s1 }
   0xa   :  { %p152_p3 = por %p151_p2, %p150_p1 }
   0xc   :  { %p153_p4 = pnand %p152_p3, %p146_p0 }
  0x83   :  { %v20_v10 = vpop.permute.xlu0 %19 }
  0x84   :  { %vm21_vm2 = vcmp.eq.s32.totalorder %v17_v9, %v20_v10 }
  0x85   :  { %v123_v11 = vsel %vm21_vm2, 1.0, %v172_v6 }
  0x86   :  { %133 = vmatmul.mubr.msk.f32.vlgmr.msra.gmra.mrb[0].mxu0 %vm26_vm1, %v123_v11 }
  0x87   :  { %v105_v12 = vpop.permute.xlu0 %104 }
 0x159   :  { %v96_v13 = vpop.f32.mrb[0].mxu0 }
 0x15a   :  { %101 = vst.msk [vmem:[#allocation2] sm:$0xff] %vm100_vm3, %v96_v13  ;;  %v134_v14 = vpop.f32.mrb[1].mxu0 }
 0x15b   :  { %108 = vst.msk [vmem:[#allocation2] sm:$0xff] %vm107_vm4, %v105_v12 }
 0x15c   :  { %156 = shalt.err (!%p153_p4)
}
 0x15d   :  { %s157_s23 = scalar_lea.hbm %s222_s3, 128 }
 0x15e   :  { %p158_p5 = scmp.ne.s32.totalorder %s222_s3, %s157_s23  ;;  %p161_p6 = scmp.lt.u32.totalorder %s157_s23, %s222_s3 }
 0x160   :  { %p163_p7 = pnand %p161_p6, %p158_p5 }
 0x162   :  { %166 = shalt.err (!%p163_p7)
}
 0x163   :  { %118 = dma.vmem_to_hbm [thread:$0]  %s116_s20, 128, %s222_s3, [#allocation3]  }
 0x164   :  { %167 = dma.done.wait [#allocation3], 128  }
 0x165   :  { %168 = vsyncadd [#allocation3], 4294967168 }
 0x166   :  { %122 = vsyncpa [#allocation3], 1 }

</bundles_post_ra>
